<compile_context>
chip_gen: v5e
topology: v5e:2x2
jax: 0.10.0
libtpu: 0.0.40
codegen_flags: <defaults>
</compile_context>

<pallas_src>
import math
import functools

import jax
import jax.numpy as jnp
from jax.experimental import pallas as pl
from jax.experimental.pallas import tpu as pltpu


# ----------------------------------------------------------------------------
# helpers
# ----------------------------------------------------------------------------
def _round_up(x, m):
    return ((x + m - 1) // m) * m


def _pick_pair_tile(npairs, bytes_per_pair, budget_bytes=8 << 20):
    """Largest pair tile P (multiple of 128 dividing npairs, or npairs itself)
    whose estimated per-block VMEM footprint stays under the budget."""
    pmax = max(128, budget_bytes // max(1, bytes_per_pair))
    if npairs <= pmax:
        return npairs
    best = 0
    p = 128
    while p <= pmax:
        if npairs % p == 0:
            best = p
        p += 128
    if best:
        return best
    # TODO(synk): Na*Na has no 128-aligned divisor under the budget; fall back to
    # the full pair dimension (may exceed the budget for unusual Na).
    return npairs


# ----------------------------------------------------------------------------
# Pallas kernel: fused atom-pair pipeline for one (batch, pair-tile).
#   pidx  : [1, 1, P] int32   pair-type id  (atoms[j]*V + atoms[i])
#   dist  : [1, 1, P] f32     pairwise distance
#   bond  : [1, 1, P] int32   bond-type id
#   wbtab : [2*apo8, V2p] f32 stacked, transformed apair tables (W*istd ; (B-m)*istd)^T
#   wall  : [H8, apo8+Vbp] f32 fused [w_lin*coef ; bond_emb]^T
#   blin  : [H8, 1] f32       apair_linear bias
#   out   : [1, H8, P] f32    lane-dense, pre-transposed, atom-pad-masked block
# ----------------------------------------------------------------------------
def _pair_kernel(pidx_ref, dist_ref, bond_ref, wbtab_ref, wall_ref, blin_ref,
                 o_ref, *, apo8, voc, pad_tok):
    p = pidx_ref.shape[2]
    pidx = pidx_ref[0]                           # [1, P] int32
    dist = dist_ref[0]                           # [1, P] f32
    bond = bond_ref[0]                           # [1, P] int32
    v2p = wbtab_ref.shape[1]
    vbp = wall_ref.shape[1] - apo8

    # In-VMEM gather of apair_weight'/apair_bias' rows: one-hot over the pair id,
    # both tables fetched in a single fused MXU pass (pairs in lanes).
    oh = (jax.lax.broadcasted_iota(jnp.int32, (v2p, p), 0) == pidx)
    pwpb = jnp.dot(wbtab_ref[...], oh.astype(jnp.float32),
                   preferred_element_type=jnp.float32)            # [2*apo8, P]

    # Gaussian smearing; means / std / coefficient were pre-folded into the
    # tables and into the linear weight, so this is just exp(-z^2/2) (EUP).
    z = pwpb[:apo8, :] * dist + pwpb[apo8:, :]
    g = jnp.exp(-0.5 * (z * z))                                   # [apo8, P]

    # Fused apair_linear + bond-type embedding: one [H8, apo8+Vbp] x [.., P] matmul.
    boh = (jax.lax.broadcasted_iota(jnp.int32, (vbp, p), 0) == bond)
    feat = jnp.concatenate([g, boh.astype(jnp.float32)], axis=0)  # [apo8+Vbp, P]
    out = jnp.dot(wall_ref[...], feat, preferred_element_type=jnp.float32)
    out = out + blin_ref[...]                                     # [H8, P]

    # Atom-pad column mask folded into the (lane-dense) store:
    # column atom is pad  <=>  pidx in [pad*V, (pad+1)*V).
    col_pad = jnp.logical_and(pidx >= pad_tok * voc, pidx < (pad_tok + 1) * voc)
    o_ref[0] = jnp.where(col_pad, -jnp.inf, out)


# ----------------------------------------------------------------------------
# wrapper: full UnimolETEmbedding.forward
# ----------------------------------------------------------------------------
def unimol_et_embedding(params, atoms, chirals, coordinates, bonds,
                        bond_indices, bond_values, bdist, *,
                        nhead, atom_voc_size, sup_bdist,
                        atom_pad_token=0, bond_pad_token=0):
    B, Na = atoms.shape
    Nb = bond_values.shape[1]
    H = nhead
    apo = params["apair_w_emb"].shape[1]
    bond_voc = params["bond_emb"].shape[0]

    atoms = atoms.astype(jnp.int32)
    chirals = chirals.astype(jnp.int32)
    bonds_i = bonds.astype(jnp.int32)
    bond_indices = bond_indices.astype(jnp.int32)
    bond_values = bond_values.astype(jnp.int32)

    # ---------------- sequence embedding path (XLA gathers) -----------------
    atoms_e = jnp.take(params["atype_emb"], atoms, axis=0)
    atoms_e = atoms_e + jnp.take(params["chiral_emb"], chirals, axis=0)
    b0 = jnp.take_along_axis(atoms, bond_indices[:, :, 0], axis=1)
    b1 = jnp.take_along_axis(atoms, bond_indices[:, :, 1], axis=1)
    bonds_e = (jnp.take(params["btype_emb"], bond_values, axis=0)
               + jnp.take(params["bond_atom_emb"], b0, axis=0)
               + jnp.take(params["bond_atom_emb"], b1, axis=0))
    atoms_emb = jnp.transpose(jnp.concatenate([atoms_e, bonds_e], axis=1),
                              (1, 0, 2))                               # [L, B, D]

    # ---------------- pair path (Pallas) -------------------------------------
    npairs = Na * Na
    diff = coordinates[:, None, :, :] - coordinates[:, :, None, :]
    dist = jnp.sqrt(jnp.sum(diff * diff, axis=-1)).astype(jnp.float32)  # [B,Na,Na]
    pair_idx = atoms[:, None, :] * atom_voc_size + atoms[:, :, None]    # [B,Na,Na]

    pidx_flat = pair_idx.reshape(B, 1, npairs)
    dist_flat = dist.reshape(B, 1, npairs)
    bond_flat = bonds_i.reshape(B, 1, npairs)

    # Fold gaussian params into the (tiny) tables / linear weight (done once).
    apo8 = _round_up(apo, 8)
    h8 = _round_up(H, 8)
    v2 = atom_voc_size * atom_voc_size
    v2p = _round_up(v2, 128)
    vbp = _round_up(bond_voc, 8)

    stds = jnp.abs(params["stds"]).astype(jnp.float32) + 1e-5
    istd = 1.0 / stds
    coef = 1.0 / (math.sqrt(2.0 * math.pi) * stds)
    means = params["means"].astype(jnp.float32)

    w_tab = params["apair_w_emb"].astype(jnp.float32) * istd[None, :]
    b_tab = (params["apair_b_emb"].astype(jnp.float32) - means[None, :]) * istd[None, :]
    w_pad = jnp.pad(w_tab, ((0, v2p - v2), (0, apo8 - apo)))
    b_pad = jnp.pad(b_tab, ((0, v2p - v2), (0, apo8 - apo)))
    wbtab = jnp.concatenate([w_pad, b_pad], axis=1).T                   # [2*apo8, v2p]

    wlin_scaled = params["w_lin"].astype(jnp.float32) * coef[:, None]   # [apo, H]
    wlin_pad = jnp.pad(wlin_scaled, ((0, apo8 - apo), (0, h8 - H)))     # [apo8, h8]
    btab_pad = jnp.pad(params["bond_emb"].astype(jnp.float32),
                       ((0, vbp - bond_voc), (0, h8 - H)))              # [vbp, h8]
    w_all = jnp.concatenate([wlin_pad, btab_pad], axis=0).T             # [h8, apo8+vbp]
    blin_col = jnp.pad(params["b_lin"].astype(jnp.float32).reshape(1, H),
                       ((0, 0), (0, h8 - H))).reshape(h8, 1)            # [h8, 1]

    # VMEM budget -> pair-tile size (pairs in lanes).
    bytes_per_pair = 4 * (v2p + 4 * apo8 + 2 * vbp + h8) + 2 * (12 + 4 * h8)
    P = _pick_pair_tile(npairs, bytes_per_pair, budget_bytes=8 << 20)
    grid = (B, npairs // P)

    kern = functools.partial(_pair_kernel, apo8=apo8, voc=atom_voc_size,
                             pad_tok=atom_pad_token)
    tile3 = lambda b, t: (b, 0, t)
    cst2 = lambda b, t: (0, 0)

    aa_flat = pl.pallas_call(
        kern,
        grid=grid,
        in_specs=[
            pl.BlockSpec((1, 1, P), tile3),                 # pair-type ids
            pl.BlockSpec((1, 1, P), tile3),                 # distances
            pl.BlockSpec((1, 1, P), tile3),                 # bond-type ids
            pl.BlockSpec((2 * apo8, v2p), cst2),            # transformed pair tables
            pl.BlockSpec((h8, apo8 + vbp), cst2),           # fused linear + bond table
            pl.BlockSpec((h8, 1), cst2),                    # apair_linear bias
        ],
        out_specs=pl.BlockSpec((1, h8, P), tile3),
        out_shape=jax.ShapeDtypeStruct((B, h8, npairs), jnp.float32),
        compiler_params=pltpu.CompilerParams(
            dimension_semantics=("parallel", "parallel"),
            vmem_limit_bytes=64 * 1024 * 1024),
    )(pidx_flat, dist_flat, bond_flat, wbtab, w_all, blin_col)

    apairs_aa = aa_flat[:, :H, :].reshape(B, H, Na, Na)     # free reshape; slice fuses

    # ---------------- block assembly (small XLA glue, already [B,H,...]) -----
    neg_inf = jnp.float32(-jnp.inf)
    atom_col_pad = (atoms == atom_pad_token)                 # [B, Na]
    bond_col_pad = (bond_values == bond_pad_token)           # [B, Nb]

    oh = (jax.nn.one_hot(bond_indices[:, :, 0], Na, dtype=jnp.int32)
          + jax.nn.one_hot(bond_indices[:, :, 1], Na, dtype=jnp.int32))
    oh = oh * (bond_values != bond_pad_token).astype(jnp.int32)[:, :, None]   # [B,Nb,Na]
    abp = jnp.take(params["ab_connect_emb"], oh, axis=0)                      # [B,Nb,Na,H]

    ab_blk = jnp.transpose(abp, (0, 3, 2, 1))                # [B,H,Na,Nb]
    ab_blk = jnp.where(bond_col_pad[:, None, None, :], neg_inf, ab_blk)
    ba_blk = jnp.transpose(abp, (0, 3, 1, 2))                # [B,H,Nb,Na]
    ba_blk = jnp.where(atom_col_pad[:, None, None, :], neg_inf, ba_blk)
    bb_blk = jnp.where(bond_col_pad[:, None, None, :], neg_inf,
                       jnp.zeros((B, H, Nb, Nb), jnp.float32))

    top = jnp.concatenate([apairs_aa, ab_blk], axis=3)       # [B,H,Na,L]
    bot = jnp.concatenate([ba_blk, bb_blk], axis=3)          # [B,H,Nb,L]
    apairs_out = jnp.concatenate([top, bot], axis=2)         # [B,H,L,L]

    padding_mask = jnp.concatenate([atoms == atom_pad_token,
                                    bond_values == bond_pad_token], axis=1)   # [B,L]

    ohs = oh * sup_bdist
    bd_left = jnp.concatenate([bdist, ohs], axis=1)                            # [B,L,Na]
    bd_right = jnp.concatenate([jnp.transpose(ohs, (0, 2, 1)),
                                jnp.zeros((B, Nb, Nb), bdist.dtype)], axis=1)  # [B,L,Nb]
    bdist_out = jnp.concatenate([bd_left, bd_right], axis=2)                   # [B,L,L]

    return atoms_emb, apairs_out, bdist_out, padding_mask


# ----------------------------------------------------------------------------
# deterministic parameter init (embedding padding rows zeroed like PyTorch)
# ----------------------------------------------------------------------------
def init_params(key, *, nhead, d_model, atom_voc_size, bond_voc_size,
                apair_emb_size, chiral_voc_size=4,
                atom_pad_token=0, bond_pad_token=0, chiral_pad_token=0):
    ks = jax.random.split(key, 12)

    def emb(k, voc, dim, pad=None, scale=0.1):
        t = scale * jax.random.normal(k, (voc, dim), jnp.float32)
        if pad is not None:
            t = t.at[pad].set(0.0)
        return t

    apo = apair_emb_size
    bound = 1.0 / math.sqrt(apo)
    w_lin = jax.random.uniform(ks[8], (apo, nhead), jnp.float32, -bound, bound)
    b_lin = jax.random.uniform(ks[9], (1, nhead), jnp.float32, -bound, bound)

    return dict(
        atype_emb=emb(ks[0], atom_voc_size, d_model, atom_pad_token),
        chiral_emb=emb(ks[1], chiral_voc_size, d_model, chiral_pad_token),
        apair_w_emb=emb(ks[2], atom_voc_size ** 2, apo),
        apair_b_emb=emb(ks[3], atom_voc_size ** 2, apo),
        means=0.1 * jax.random.normal(ks[4], (apo,), jnp.float32),
        stds=0.5 + jax.random.uniform(ks[5], (apo,), jnp.float32, 0.0, 1.0),
        bond_emb=emb(ks[6], bond_voc_size, nhead, bond_pad_token),
        btype_emb=emb(ks[7], bond_voc_size, d_model, bond_pad_token),
        bond_atom_emb=emb(ks[10], atom_voc_size, d_model, atom_pad_token),
        ab_connect_emb=emb(ks[11], 2, nhead, 0),
        w_lin=w_lin, b_lin=b_lin,
    )


# ----------------------------------------------------------------------------
# pure-JAX reference (mirrors the PyTorch forward 1:1) for verification
# ----------------------------------------------------------------------------
def reference(params, atoms, chirals, coordinates, bonds, bond_indices,
              bond_values, bdist, *, nhead, atom_voc_size, sup_bdist,
              atom_pad_token=0, bond_pad_token=0):
    B, Na = atoms.shape
    Nb = bond_values.shape[1]
    H = nhead

    atoms_emb = params["atype_emb"][atoms] + params["chiral_emb"][chirals]
    b0 = jnp.take_along_axis(atoms, bond_indices[:, :, 0], axis=1)
    b1 = jnp.take_along_axis(atoms, bond_indices[:, :, 1], axis=1)
    bonds_emb = (params["btype_emb"][bond_values]
                 + params["bond_atom_emb"][b0] + params["bond_atom_emb"][b1])
    atoms_emb = jnp.transpose(jnp.concatenate([atoms_emb, bonds_emb], axis=1), (1, 0, 2))

    diff = coordinates[:, None, :, :] - coordinates[:, :, None, :]
    distances = jnp.sqrt(jnp.sum(diff ** 2, axis=-1))
    pidx = atoms[:, None, :] * atom_voc_size + atoms[:, :, None]
    ap = params["apair_w_emb"][pidx] * distances[..., None] + params["apair_b_emb"][pidx]
    bnd = params["bond_emb"][bonds]
    stds = jnp.abs(params["stds"]) + 1e-5
    ap = jnp.exp(-0.5 * ((ap - params["means"]) / stds) ** 2) / (math.sqrt(2 * math.pi) * stds)
    ap = ap @ params["w_lin"] + params["b_lin"].reshape(-1) + bnd

    oh = (jax.nn.one_hot(bond_indices[:, :, 0], Na, dtype=jnp.int32)
          + jax.nn.one_hot(bond_indices[:, :, 1], Na, dtype=jnp.int32))
    oh = oh * (bond_values != bond_pad_token).astype(jnp.int32)[:, :, None]
    abp = params["ab_connect_emb"][oh]

    left = jnp.concatenate([ap, abp], axis=1)
    right = jnp.concatenate([jnp.transpose(abp, (0, 2, 1, 3)),
                             jnp.zeros((B, Nb, Nb, H), jnp.float32)], axis=1)
    apairs = jnp.concatenate([left, right], axis=2)
    padding_mask = jnp.concatenate([atoms == atom_pad_token,
                                    bond_values == bond_pad_token], axis=1)
    apairs = jnp.where(padding_mask[:, None, :, None], -jnp.inf, apairs)
    apairs = jnp.transpose(apairs, (0, 3, 1, 2))

    ohs = oh * sup_bdist
    bd_left = jnp.concatenate([bdist, ohs], axis=1)
    bd_right = jnp.concatenate([jnp.transpose(ohs, (0, 2, 1)),
                                jnp.zeros((B, Nb, Nb), bdist.dtype)], axis=1)
    bdist_out = jnp.concatenate([bd_left, bd_right], axis=2)
    return atoms_emb, apairs, bdist_out, padding_mask


if __name__ == "__main__":
    key = jax.random.PRNGKey(0)
    B, Na, Nb = 2, 16, 8
    D, H, APO = 32, 4, 16
    ATOM_VOC, BOND_VOC, CHIRAL_VOC = 9, 5, 4
    SUP_BDIST = 7

    kp, ka, kc, kx, kb, ki, kv, kd = jax.random.split(key, 8)

    atoms = jax.random.randint(ka, (B, Na), 1, ATOM_VOC)
    atoms = atoms.at[0, 14:].set(0).at[1, 12:].set(0)          # atom padding
    chirals = jax.random.randint(kc, (B, Na), 1, CHIRAL_VOC)
    chirals = jnp.where(atoms == 0, 0, chirals)
    coordinates = jax.random.normal(kx, (B, Na, 3), jnp.float32)
    bonds = jax.random.randint(kb, (B, Na, Na), 0, BOND_VOC)
    i0 = jax.random.randint(ki, (B, Nb), 0, Na)
    i1 = (i0 + 1 + jax.random.randint(kv, (B, Nb), 0, Na - 1)) % Na
    bond_indices = jnp.stack([i0, i1], axis=-1)
    bond_values = jax.random.randint(kd, (B, Nb), 1, BOND_VOC)
    bond_values = bond_values.at[:, 6:].set(0)                 # bond padding
    bdist = jax.random.randint(jax.random.fold_in(key, 99), (B, Na, Na), 0, 10)

    params = init_params(kp, nhead=H, d_model=D, atom_voc_size=ATOM_VOC,
                         bond_voc_size=BOND_VOC, apair_emb_size=APO,
                         chiral_voc_size=CHIRAL_VOC)

    fwd = jax.jit(functools.partial(
        unimol_et_embedding, nhead=H, atom_voc_size=ATOM_VOC, sup_bdist=SUP_BDIST))
    outs = fwd(params, atoms, chirals, coordinates, bonds,
               bond_indices, bond_values, bdist)
    jax.block_until_ready(outs)
    atoms_emb, apairs, bdist_out, padding_mask = outs

    r_atoms_emb, r_apairs, r_bdist, r_mask = reference(
        params, atoms, chirals, coordinates, bonds, bond_indices, bond_values,
        bdist, nhead=H, atom_voc_size=ATOM_VOC, sup_bdist=SUP_BDIST)

    L = Na + Nb
    assert atoms_emb.shape == (L, B, D)
    assert apairs.shape == (B, H, L, L)
    assert bdist_out.shape == (B, L, L)
    assert padding_mask.shape == (B, L)

    assert jnp.allclose(atoms_emb, r_atoms_emb, atol=1e-5, rtol=1e-5), \
        float(jnp.max(jnp.abs(atoms_emb - r_atoms_emb)))
    assert jnp.allclose(apairs, r_apairs, atol=5e-4, rtol=5e-4)
    assert jnp.array_equal(bdist_out, r_bdist)
    assert jnp.array_equal(padding_mask, r_mask)

    print("KERNEL_OK")
</pallas_src>

<mosaic_0001>
module attributes {stable_mosaic.version = 11 : i64} {
  func.func @_pair_kernel(%arg0: i32, %arg1: i32, %arg2: memref<1x1x256xi32, #tpu.memory_space<vmem>>, %arg3: memref<1x1x256xf32, #tpu.memory_space<vmem>>, %arg4: memref<1x1x256xi32, #tpu.memory_space<vmem>>, %arg5: memref<32x128xf32, #tpu.memory_space<vmem>>, %arg6: memref<8x24xf32, #tpu.memory_space<vmem>>, %arg7: memref<8x1xf32, #tpu.memory_space<vmem>>, %arg8: memref<1x8x256xf32, #tpu.memory_space<vmem>>) attributes {dimension_semantics = [#tpu.dimension_semantics<parallel>, #tpu.dimension_semantics<parallel>], iteration_bounds = array<i64: 2, 1>, scalar_prefetch = 0 : i64, scratch_operands = 0 : i64, tpu.core_type = #tpu.core_type<tc>, window_params = [{transform_indices = @transform_0, window_bounds = array<i64: 1, 1, 256>}, {transform_indices = @transform_1, window_bounds = array<i64: 1, 1, 256>}, {transform_indices = @transform_2, window_bounds = array<i64: 1, 1, 256>}, {pipeline_mode = #tpu.pipeline_mode<synchronous>, transform_indices = @transform_3, window_bounds = array<i64: 32, 128>}, {pipeline_mode = #tpu.pipeline_mode<synchronous>, transform_indices = @transform_4, window_bounds = array<i64: 8, 24>}, {pipeline_mode = #tpu.pipeline_mode<synchronous>, transform_indices = @transform_5, window_bounds = array<i64: 8, 1>}, {transform_indices = @transform_6, window_bounds = array<i64: 1, 8, 256>}]} {
    %c0 = arith.constant 0 : index
    %c0_0 = arith.constant 0 : index
    %c0_1 = arith.constant 0 : index
    %0 = vector.load %arg2[%c0, %c0_0, %c0_1] : memref<1x1x256xi32, #tpu.memory_space<vmem>>, vector<1x1x256xi32>
    %1 = vector.shape_cast %0 : vector<1x1x256xi32> to vector<1x256xi32>
    %c0_2 = arith.constant 0 : index
    %c0_3 = arith.constant 0 : index
    %c0_4 = arith.constant 0 : index
    %2 = vector.load %arg3[%c0_2, %c0_3, %c0_4] : memref<1x1x256xf32, #tpu.memory_space<vmem>>, vector<1x1x256xf32>
    %3 = vector.shape_cast %2 : vector<1x1x256xf32> to vector<1x256xf32>
    %c0_5 = arith.constant 0 : index
    %c0_6 = arith.constant 0 : index
    %c0_7 = arith.constant 0 : index
    %4 = vector.load %arg4[%c0_5, %c0_6, %c0_7] : memref<1x1x256xi32, #tpu.memory_space<vmem>>, vector<1x1x256xi32>
    %5 = vector.shape_cast %4 : vector<1x1x256xi32> to vector<1x256xi32>
    %6 = tpu.iota {dimensions = array<i32: 0>} : vector<128x256xi32>
    %7 = vector.broadcast %1 : vector<1x256xi32> to vector<128x256xi32>
    %8 = arith.cmpi eq, %6, %7 : vector<128x256xi32>
    %c0_8 = arith.constant 0 : index
    %c0_9 = arith.constant 0 : index
    %9 = vector.load %arg5[%c0_8, %c0_9] : memref<32x128xf32, #tpu.memory_space<vmem>>, vector<32x128xf32>
    %10 = arith.extui %8 : vector<128x256xi1> to vector<128x256xi32>
    %11 = arith.sitofp %10 : vector<128x256xi32> to vector<128x256xf32>
    %cst = arith.constant dense<0.000000e+00> : vector<32x256xf32>
    %12 = tpu.matmul %9, %11, %cst {dimension_numbers = #tpu.dot_dimension_numbers<[1], [0], [0], [1], [0, 0, 1, 1], [], []>} : vector<32x128xf32>, vector<128x256xf32>, vector<32x256xf32> -> vector<32x256xf32>
    %13 = vector.extract_strided_slice %12 {offsets = [0, 0], sizes = [16, 256], strides = [1, 1]} : vector<32x256xf32> to vector<16x256xf32>
    %14 = vector.broadcast %3 : vector<1x256xf32> to vector<16x256xf32>
    %15 = arith.mulf %13, %14 : vector<16x256xf32>
    %16 = vector.extract_strided_slice %12 {offsets = [16, 0], sizes = [16, 256], strides = [1, 1]} : vector<32x256xf32> to vector<16x256xf32>
    %17 = arith.addf %15, %16 : vector<16x256xf32>
    %18 = arith.mulf %17, %17 : vector<16x256xf32>
    %cst_10 = arith.constant -5.000000e-01 : f32
    %19 = vector.broadcast %cst_10 : f32 to vector<16x256xf32>
    %20 = arith.mulf %19, %18 : vector<16x256xf32>
    %21 = math.exp %20 : vector<16x256xf32>
    %22 = tpu.iota {dimensions = array<i32: 0>} : vector<8x256xi32>
    %23 = vector.broadcast %5 : vector<1x256xi32> to vector<8x256xi32>
    %24 = arith.cmpi eq, %22, %23 : vector<8x256xi32>
    %25 = arith.extui %24 : vector<8x256xi1> to vector<8x256xi32>
    %26 = arith.sitofp %25 : vector<8x256xi32> to vector<8x256xf32>
    %27 = tpu.concatenate %21, %26 in 0 : vector<16x256xf32>, vector<8x256xf32> -> vector<24x256xf32>
    %c0_11 = arith.constant 0 : index
    %c0_12 = arith.constant 0 : index
    %28 = vector.load %arg6[%c0_11, %c0_12] : memref<8x24xf32, #tpu.memory_space<vmem>>, vector<8x24xf32>
    %cst_13 = arith.constant dense<0.000000e+00> : vector<8x256xf32>
    %29 = tpu.matmul %28, %27, %cst_13 {dimension_numbers = #tpu.dot_dimension_numbers<[1], [0], [0], [1], [0, 0, 1, 1], [], []>} : vector<8x24xf32>, vector<24x256xf32>, vector<8x256xf32> -> vector<8x256xf32>
    %c0_14 = arith.constant 0 : index
    %c0_15 = arith.constant 0 : index
    %30 = vector.load %arg7[%c0_14, %c0_15] : memref<8x1xf32, #tpu.memory_space<vmem>>, vector<8x1xf32>
    %31 = vector.broadcast %30 : vector<8x1xf32> to vector<8x256xf32>
    %32 = arith.addf %29, %31 : vector<8x256xf32>
    %c0_i32 = arith.constant 0 : i32
    %33 = vector.broadcast %c0_i32 : i32 to vector<1x256xi32>
    %34 = arith.cmpi sge, %1, %33 : vector<1x256xi32>
    %c9_i32 = arith.constant 9 : i32
    %35 = vector.broadcast %c9_i32 : i32 to vector<1x256xi32>
    %36 = arith.cmpi slt, %1, %35 : vector<1x256xi32>
    %37 = arith.andi %34, %36 : vector<1x256xi1>
    %cst_16 = arith.constant 0xFF800000 : f32
    %38 = vector.shape_cast %37 : vector<1x256xi1> to vector<1x256xi1>
    %39 = vector.broadcast %38 : vector<1x256xi1> to vector<8x256xi1>
    %40 = vector.broadcast %cst_16 : f32 to vector<8x256xf32>
    %41 = arith.select %39, %40, %32 : vector<8x256xi1>, vector<8x256xf32>
    %c0_17 = arith.constant 0 : index
    %c0_18 = arith.constant 0 : index
    %c0_19 = arith.constant 0 : index
    %42 = vector.load %arg8[%c0_17, %c0_18, %c0_19] : memref<1x8x256xf32, #tpu.memory_space<vmem>>, vector<1x8x256xf32>
    %43 = vector.shape_cast %42 : vector<1x8x256xf32> to vector<8x256xf32>
    %44 = vector.shape_cast %41 : vector<8x256xf32> to vector<1x8x256xf32>
    tpu.vector_store %arg8[%c0_17, %c0_18, %c0_19], %44 {strides = array<i32>} : memref<1x8x256xf32, #tpu.memory_space<vmem>>, vector<1x8x256xf32>,
    return
  }
  func.func @transform_0(%arg0: i32, %arg1: i32) -> (i32, i32, i32) {
    %c0_i32 = arith.constant 0 : i32
    %c0_i32_0 = arith.constant 0 : i32
    return %arg0, %c0_i32, %arg1 : i32, i32, i32
  }
  func.func @transform_1(%arg0: i32, %arg1: i32) -> (i32, i32, i32) {
    %c0_i32 = arith.constant 0 : i32
    %c0_i32_0 = arith.constant 0 : i32
    return %arg0, %c0_i32, %arg1 : i32, i32, i32
  }
  func.func @transform_2(%arg0: i32, %arg1: i32) -> (i32, i32, i32) {
    %c0_i32 = arith.constant 0 : i32
    %c0_i32_0 = arith.constant 0 : i32
    return %arg0, %c0_i32, %arg1 : i32, i32, i32
  }
  func.func @transform_3(%arg0: i32, %arg1: i32) -> (i32, i32) {
    %c0_i32 = arith.constant 0 : i32
    %c0_i32_0 = arith.constant 0 : i32
    %c0_i32_1 = arith.constant 0 : i32
    return %c0_i32, %c0_i32_0 : i32, i32
  }
  func.func @transform_4(%arg0: i32, %arg1: i32) -> (i32, i32) {
    %c0_i32 = arith.constant 0 : i32
    %c0_i32_0 = arith.constant 0 : i32
    %c0_i32_1 = arith.constant 0 : i32
    return %c0_i32, %c0_i32_0 : i32, i32
  }
  func.func @transform_5(%arg0: i32, %arg1: i32) -> (i32, i32) {
    %c0_i32 = arith.constant 0 : i32
    %c0_i32_0 = arith.constant 0 : i32
    %c0_i32_1 = arith.constant 0 : i32
    return %c0_i32, %c0_i32_0 : i32, i32
  }
  func.func @transform_6(%arg0: i32, %arg1: i32) -> (i32, i32, i32) {
    %c0_i32 = arith.constant 0 : i32
    %c0_i32_0 = arith.constant 0 : i32
    return %arg0, %c0_i32, %arg1 : i32, i32, i32
  }
}

</mosaic_0001>

<bundles_post_ra>
// kernel: unimol_et_embedding.1
= control target key start
LH: loop header
LB: loop body
LE: loop exit
PB: predicated region body
PF: predicated region fallthrough
CT: control target
= control target key end

     0   :  { %s959_s21 = smov 0   ;;  %s961_s22 = smov 0   ;;  %s1190_s0 = inlined_call_operand.vmem [shape: s32[2,1,256], index: 0, kind: input, shape index: {}]   ;;  %s1191_s1 = inlined_call_operand.vmem [shape: f32[2,1,256], index: 1, kind: input, shape index: {}]   ;;  %s1192_s2 = inlined_call_operand.vmem [shape: s32[2,1,256], index: 2, kind: input, shape index: {}]   ;;  %s1193_s3 = inlined_call_operand.vmem [shape: f32[32,128], index: 3, kind: input, shape index: {}]   ;;  %s1194_s4 = inlined_call_operand.vmem [shape: f32[8,24], index: 4, kind: input, shape index: {}]   ;;  %s1195_s5 = inlined_call_operand.vmem [shape: f32[8,1], index: 5, kind: input, shape index: {}]   ;;  %s1196_s6 = inlined_call_operand.vmem [shape: f32[2,8,256], index: 6, kind: output, shape index: {}]  }
   0x1   :  { %s963_s23 = smov 0  }
   0x2 LB: > { %s28_s24 = sadd.s32 1, %s916_s22  ;;  %p752_p0 = scmp.ge.s32.totalorder %s920_s23, 1  ;;  %s920_s23 = sphi %s963_s23, %s16_s23   ;;  %s916_s22 = sphi %s961_s22, %s1198_s22   ;;  %s912_s21 = sphi %s959_s21, %s1197_s21  }
   0x3   : > { %p30_p1 = scmp.ge.s32.totalorder %s28_s24, 2  ;;  %p264_p2 = scmp.lt.s32.totalorder %s920_s23, 3 }
   0x5   : > { %s1200_s24 = smov (%p30_p1, %s28_s24), 0  ;;  %p265_p3 = pnand %p752_p0, %p264_p2 }
   0x6   : > { %p318_p4 = scmp.lt.s32.totalorder (!%p265_p3), %s912_s21, 1 }
   0x7   : > { %268 = sbr.rel (%p265_p3) target bundleno = 345 (0x159), region = 44 }
   0xc   : > { %v357_v0 = vlaneseq  ;;  %s1202_s21 = smov (!%p318_p4, %s912_s21), 1  ;;  %v922_v9 = vmov 1.0   ;;  %v410_v21 = vld [vmem:[%s1193_s3 + $0x10] sm:$0xff]  ;;  %v408_v22 = vld [vmem:[%s1193_s3] sm:$0xff]  ;;  %v411_v23 = vld [vmem:[%s1193_s3 + $0x18] sm:$0xff]  ;;  %v923_v33 = vmov 0  }
   0xd   : > { %s982_s25 = sshll.u32 %s1202_s21, 1  ;;  %v409_v24 = vld [vmem:[%s1193_s3 + $0x8] sm:$0xff]  ;;  %v572_v31 = vld [vmem:[%s1195_s5] sm:$0xff]  ;;  %889 = vset.pattern.permute.xlu0 %v923_v33  ;;  %s830_s27 = sshll.u32 %s1202_s21, 4 }
   0xe   : > { %v979_v1 = vshrl.u32 %v357_v0, 7  ;;  %s324_s28 = scalar_lea.vmem %s1190_s0, %s982_s25  ;;  %s342_s15 = scalar_lea.vmem %s1192_s2, %s982_s25  ;;  %575 = vperm.xlu0 %889, %v572_v31   ;;  %v571_v0 = vld [vmem:[%s1194_s4] sm:$0xff] }
   0xf   : > { %v990_v4 = vld [vmem:[%s324_s28] sm:$0x3]  ;;  %s333_s18 = scalar_lea.vmem %s1191_s1, %s982_s25  ;;  %s352_s30 = scalar_lea.vmem %s1196_s6, %s830_s27 }
  0x10   : > { %v373_v2 = vadd.s32 120, %v979_v1  ;;  %v372_v3 = vadd.s32 112, %v979_v1  ;;  %v993_v5 = vperm.slane %v990_v4, 0  ;;  %v996_v6 = vperm.slane %v990_v4, 1  ;;  %v356_v25 = vld [vmem:[%s342_s15] sm:$0x3] }
  0x11   : > { %v371_v7 = vadd.s32 104, %v979_v1  ;;  %v370_v8 = vadd.s32 96, %v979_v1  ;;  %v369_v10 = vadd.s32 88, %v979_v1  ;;  %v368_v11 = vadd.s32 80, %v979_v1  ;;  %v355_v28 = vld [vmem:[%s333_s18] sm:$0x3] }
  0x12   : > { %vm406_vm0 = vcmp.eq.s32.totalorder %v373_v2, %v993_v5  ;;  %vm407_vm1 = vcmp.eq.s32.totalorder %v373_v2, %v996_v6  ;;  %vm404_vm2 = vcmp.eq.s32.totalorder %v372_v3, %v993_v5  ;;  %vm405_vm3 = vcmp.eq.s32.totalorder %v372_v3, %v996_v6 }
  0x13   : > { %831 = vmatpush.msk.msra.mxu2 %vm406_vm0, %v922_v9  ;;  %806 = vmatpush.msk.msra.mxu1 %vm407_vm1, %v922_v9  ;;  %vm402_vm4 = vcmp.eq.s32.totalorder %v371_v7, %v993_v5  ;;  %vm403_vm5 = vcmp.eq.s32.totalorder %v371_v7, %v996_v6  ;;  %vm400_vm6 = vcmp.eq.s32.totalorder %v370_v8, %v993_v5  ;;  %v367_v12 = vadd.s32 72, %v979_v1 }
  0x14   : > { %790 = vmatpush.msk.msra.mxu0 %vm406_vm0, %v922_v9  ;;  %847 = vmatpush.msk.msra.mxu3 %vm407_vm1, %v922_v9  ;;  %vm401_vm7 = vcmp.eq.s32.totalorder %v370_v8, %v996_v6  ;;  %vm398_vm8 = vcmp.eq.s32.totalorder %v369_v10, %v993_v5  ;;  %vm399_vm9 = vcmp.eq.s32.totalorder %v369_v10, %v996_v6  ;;  %v366_v13 = vadd.s32 64, %v979_v1 }
  0x15   : > { %832 = vmatpush.msk.msra.mxu2 %vm404_vm2, %v922_v9  ;;  %807 = vmatpush.msk.msra.mxu1 %vm405_vm3, %v922_v9  ;;  %vm396_vm10 = vcmp.eq.s32.totalorder %v368_v11, %v993_v5  ;;  %vm397_vm11 = vcmp.eq.s32.totalorder %v368_v11, %v996_v6  ;;  %vm394_vm12 = vcmp.eq.s32.totalorder %v367_v12, %v993_v5  ;;  %v365_v14 = vadd.s32 56, %v979_v1 }
  0x16   : > { %791 = vmatpush.msk.msra.mxu0 %vm404_vm2, %v922_v9  ;;  %848 = vmatpush.msk.msra.mxu3 %vm405_vm3, %v922_v9  ;;  %vm395_vm13 = vcmp.eq.s32.totalorder %v367_v12, %v996_v6  ;;  %vm392_vm14 = vcmp.eq.s32.totalorder %v366_v13, %v993_v5  ;;  %vm393_vm15 = vcmp.eq.s32.totalorder %v366_v13, %v996_v6  ;;  %v364_v15 = vadd.s32 48, %v979_v1 }
  0x17   : > { %833 = vmatpush.msk.msra.mxu2 %vm402_vm4, %v922_v9  ;;  %808 = vmatpush.msk.msra.mxu1 %vm403_vm5, %v922_v9  ;;  %vm390_vm0 = vcmp.eq.s32.totalorder %v365_v14, %v993_v5  ;;  %vm391_vm1 = vcmp.eq.s32.totalorder %v365_v14, %v996_v6  ;;  %v363_v16 = vadd.s32 40, %v979_v1  ;;  %v362_v17 = vadd.s32 32, %v979_v1 }
  0x18   : > { %792 = vmatpush.msk.msra.mxu0 %vm402_vm4, %v922_v9  ;;  %849 = vmatpush.msk.msra.mxu3 %vm403_vm5, %v922_v9  ;;  %vm388_vm2 = vcmp.eq.s32.totalorder %v364_v15, %v993_v5  ;;  %vm389_vm3 = vcmp.eq.s32.totalorder %v364_v15, %v996_v6  ;;  %v361_v18 = vadd.s32 24, %v979_v1  ;;  %v360_v19 = vadd.s32 16, %v979_v1 }
  0x19   : > { %834 = vmatpush.msk.msra.mxu2 %vm400_vm6, %v922_v9  ;;  %809 = vmatpush.msk.msra.mxu1 %vm401_vm7, %v922_v9  ;;  %vm386_vm4 = vcmp.eq.s32.totalorder %v363_v16, %v993_v5  ;;  %vm387_vm5 = vcmp.eq.s32.totalorder %v363_v16, %v996_v6  ;;  %v359_v20 = vadd.s32 8, %v979_v1  ;;  %v564_v26 = vperm.slane %v356_v25, 1 }
  0x1a   : > { %793 = vmatpush.msk.msra.mxu0 %vm400_vm6, %v922_v9  ;;  %850 = vmatpush.msk.msra.mxu3 %vm401_vm7, %v922_v9  ;;  %vm384_vm6 = vcmp.eq.s32.totalorder %v362_v17, %v993_v5  ;;  %vm385_vm7 = vcmp.eq.s32.totalorder %v362_v17, %v996_v6  ;;  %v563_v27 = vperm.slane %v356_v25, 0  ;;  %v535_v30 = vperm.slane %v355_v28, 0 }
  0x1b   : > { %835 = vmatpush.msk.msra.mxu2 %vm398_vm8, %v922_v9  ;;  %810 = vmatpush.msk.msra.mxu1 %vm399_vm9, %v922_v9  ;;  %v536_v36 = vperm.slane %v355_v28, 1 }
  0x1c   : > { %794 = vmatpush.msk.msra.mxu0 %vm398_vm8, %v922_v9  ;;  %851 = vmatpush.msk.msra.mxu3 %vm399_vm9, %v922_v9  ;;  %vm382_vm8 = vcmp.eq.s32.totalorder %v361_v18, %v993_v5  ;;  %vm383_vm9 = vcmp.eq.s32.totalorder %v361_v18, %v996_v6 }
  0x1d   : > { %836 = vmatpush.msk.msra.mxu2 %vm396_vm10, %v922_v9  ;;  %811 = vmatpush.msk.msra.mxu1 %vm397_vm11, %v922_v9 }
  0x1e   : > { %795 = vmatpush.msk.msra.mxu0 %vm396_vm10, %v922_v9  ;;  %852 = vmatpush.msk.msra.mxu3 %vm397_vm11, %v922_v9  ;;  %vm380_vm10 = vcmp.eq.s32.totalorder %v360_v19, %v993_v5  ;;  %vm381_vm11 = vcmp.eq.s32.totalorder %v360_v19, %v996_v6 }
  0x1f   : > { %837 = vmatpush.msk.msra.mxu2 %vm394_vm12, %v922_v9  ;;  %812 = vmatpush.msk.msra.mxu1 %vm395_vm13, %v922_v9 }
  0x20   : > { %796 = vmatpush.msk.msra.mxu0 %vm394_vm12, %v922_v9  ;;  %853 = vmatpush.msk.msra.mxu3 %vm395_vm13, %v922_v9  ;;  %vm378_vm12 = vcmp.eq.s32.totalorder %v359_v20, %v993_v5  ;;  %vm379_vm13 = vcmp.eq.s32.totalorder %v359_v20, %v996_v6 }
  0x21   : > { %838 = vmatpush.msk.msra.mxu2 %vm392_vm14, %v922_v9  ;;  %813 = vmatpush.msk.msra.mxu1 %vm393_vm15, %v922_v9 }
  0x22   : > { %797 = vmatpush.msk.msra.mxu0 %vm392_vm14, %v922_v9  ;;  %854 = vmatpush.msk.msra.mxu3 %vm393_vm15, %v922_v9  ;;  %vm376_vm14 = vcmp.eq.s32.totalorder %v979_v1, %v993_v5  ;;  %vm377_vm15 = vcmp.eq.s32.totalorder %v979_v1, %v996_v6 }
  0x23   : > { %839 = vmatpush.msk.msra.mxu2 %vm390_vm0, %v922_v9  ;;  %814 = vmatpush.msk.msra.mxu1 %vm391_vm1, %v922_v9 }
  0x24   : > { %798 = vmatpush.msk.msra.mxu0 %vm390_vm0, %v922_v9  ;;  %855 = vmatpush.msk.msra.mxu3 %vm391_vm1, %v922_v9  ;;  %vm566_vm0 = vcmp.eq.s32.totalorder %v979_v1, %v564_v26  ;;  %vm565_vm1 = vcmp.eq.s32.totalorder %v979_v1, %v563_v27 }
  0x25   : > { %840 = vmatpush.msk.msra.mxu2 %vm388_vm2, %v922_v9  ;;  %815 = vmatpush.msk.msra.mxu1 %vm389_vm3, %v922_v9 }
  0x26   : > { %799 = vmatpush.msk.msra.mxu0 %vm388_vm2, %v922_v9  ;;  %856 = vmatpush.msk.msra.mxu3 %vm389_vm3, %v922_v9  ;;  %vm578_vm2 = vcmask 195584   ;;  %vm622_vm3 = vcmp.ge.s32.totalorder %v990_v4, 0 }
  0x27   : > { %841 = vmatpush.msk.msra.mxu2 %vm386_vm4, %v922_v9  ;;  %816 = vmatpush.msk.msra.mxu1 %vm387_vm5, %v922_v9 }
  0x28   : > { %800 = vmatpush.msk.msra.mxu0 %vm386_vm4, %v922_v9  ;;  %857 = vmatpush.msk.msra.mxu3 %vm387_vm5, %v922_v9  ;;  %vm623_vm4 = vcmp.lt.s32.totalorder %v990_v4, 9 }
  0x29   : > { %842 = vmatpush.msk.msra.mxu2 %vm384_vm6, %v922_v9  ;;  %817 = vmatpush.msk.msra.mxu1 %vm385_vm7, %v922_v9  ;;  %vm624_vm5 = vmand %vm622_vm3, %vm623_vm4 }
  0x2a   : > { %801 = vmatpush.msk.msra.mxu0 %vm384_vm6, %v922_v9  ;;  %858 = vmatpush.msk.msra.mxu3 %vm385_vm7, %v922_v9  ;;  %v625_v2 = vsel %vm624_vm5, 1, %v923_v33 }
  0x2b   : > { %843 = vmatpush.msk.msra.mxu2 %vm382_vm8, %v922_v9  ;;  %818 = vmatpush.msk.msra.mxu1 %vm383_vm9, %v922_v9  ;;  %v626_v3 = vperm.slane %v625_v2, 0  ;;  %v627_v5 = vperm.slane %v625_v2, 1 }
  0x2c   : > { %802 = vmatpush.msk.msra.mxu0 %vm382_vm8, %v922_v9  ;;  %859 = vmatpush.msk.msra.mxu3 %vm383_vm9, %v922_v9 }
  0x2d   : > { %844 = vmatpush.msk.msra.mxu2 %vm380_vm10, %v922_v9  ;;  %819 = vmatpush.msk.msra.mxu1 %vm381_vm11, %v922_v9  ;;  %vm628_vm6 = vcmp.eq.s32.totalorder %v626_v3, 1  ;;  %vm629_vm7 = vcmp.eq.s32.totalorder %v627_v5, 1 }
  0x2e   : > { %803 = vmatpush.msk.msra.mxu0 %vm380_vm10, %v922_v9  ;;  %860 = vmatpush.msk.msra.mxu3 %vm381_vm11, %v922_v9 }
  0x2f   : > { %845 = vmatpush.msk.msra.mxu2 %vm378_vm12, %v922_v9  ;;  %820 = vmatpush.msk.msra.mxu1 %vm379_vm13, %v922_v9 }
  0x30   : > { %804 = vmatpush.msk.msra.mxu0 %vm378_vm12, %v922_v9  ;;  %861 = vmatpush.msk.msra.mxu3 %vm379_vm13, %v922_v9 }
  0x31   : > { %846 = vmatpush.msk.msra.mxu2 %vm376_vm14, %v922_v9  ;;  %821 = vmatpush.msk.msra.mxu1 %vm377_vm15, %v922_v9 }
  0x32   : > { %498 = vmatmul.f32.vlgmr.msra.gmra.mxu2 %v410_v21  ;;  %521 = vmatmul.f32.vlgmr.msra.gmra.mxu1 %v408_v22 }
  0x33   : > { %805 = vmatpush.msk.msra.mxu0 %vm376_vm14, %v922_v9  ;;  %862 = vmatpush.msk.msra.mxu3 %vm377_vm15, %v922_v9 }
  0x34   : > { %492 = vmatmul.f32.vlgmr.msra.gmra.mxu0 %v408_v22  ;;  %530 = vmatmul.f32.vlgmr.msra.gmra.mxu3 %v411_v23 }
  0x35   : > { %826 = vmatpush.msk.msrb.mxu3 %vm566_vm0, %v922_v9  ;;  %824 = vmatpush.msk.msrb.mxu2 %vm565_vm1, %v922_v9 }
  0x3a   : > { %501 = vmatmul.f32.gmra.mxu2 %v411_v23  ;;  %524 = vmatmul.f32.gmra.mxu1 %v409_v24 }
  0x3c   : > { %495 = vmatmul.f32.gmra.mxu0 %v409_v24 }
  0x42   : > { %527 = vmatmul.f32.gmra.mxu1 %v410_v21 }
  0x80   : > { %v576_v6 = vpop.permute.xlu0 %575 }
  0xaf   : > { %v522_v29 = vpop.f32.mrf.mxu1 }
  0xb0   : > { %v540_v47 = vmul.f32 %v536_v36, %v522_v29 }
  0xb1   : > { %v493_v32 = vpop.f32.mrf.mxu0 }
  0xb2   : > { %v539_v34 = vmul.f32 %v535_v30, %v493_v32 }
  0xb5   : > { %v499_v35 = vpop.f32.mrf.mxu2 }
  0xb6   : > { %v543_v37 = vadd.f32 %v539_v34, %v499_v35 }
  0xb7   : > { %v525_v38 = vpop.f32.mrf.mxu1  ;;  %v531_v39 = vpop.f32.mrf.mxu3 }
  0xb8   : > { %v542_v40 = vmul.f32 %v536_v36, %v525_v38  ;;  %v547_v44 = vmul.f32 %v543_v37, %v543_v37 }
  0xb9   : > { %v496_v41 = vpop.f32.mrf.mxu0 }
  0xba   : > { %v541_v42 = vmul.f32 %v535_v30, %v496_v41  ;;  %v546_v43 = vadd.f32 %v542_v40, %v531_v39  ;;  %v551_v50 = vmul.f32 -0.5, %v547_v44 }
  0xbc   : > { %v550_v45 = vmul.f32 %v546_v43, %v546_v43  ;;  %v555_v57 = vmul.f32 1.442695, %v551_v50 }
  0xbd   : > { %v502_v46 = vpop.f32.mrf.mxu2 }
  0xbe   : > { %v545_v48 = vadd.f32 %v541_v42, %v502_v46  ;;  %v554_v49 = vmul.f32 -0.5, %v550_v45 }
  0xbf   : > { %v528_v51 = vpop.f32.mrf.mxu1 }
  0xc0   : > { %v549_v52 = vmul.f32 %v545_v48, %v545_v48  ;;  %v561_v53 = vmul.f32 1.442695, %v554_v49  ;;  %v544_v54 = vadd.f32 %v540_v47, %v528_v51 }
  0xc2   : > { %v553_v55 = vmul.f32 -0.5, %v549_v52  ;;  %890 = vpow2.f32 %v561_v53  ;;  %v548_v56 = vmul.f32 %v544_v54, %v544_v54 }
  0xc4   : > { %v559_v58 = vmul.f32 1.442695, %v553_v55  ;;  %v552_v59 = vmul.f32 -0.5, %v548_v56 }
  0xc6   : > { %892 = vpow2.f32 %v559_v58  ;;  %v557_v60 = vmul.f32 1.442695, %v552_v59 }
  0xc7   : > { %894 = vpow2.f32 %v555_v57 }
  0xc8   : > { %v891_v61 = vpop.eup %890  ;;  %896 = vpow2.f32 %v557_v60 }
  0xc9   : > { %616 = vmatpush.msrb.mxu3 %v891_v61 }
  0xcc   : > { %v893_v62 = vpop.eup %892 }
  0xcd   : > { %v895_v63 = vpop.eup %894  ;;  %596 = vmatpush.msrb.mxu2 %v893_v62 }
  0xce   : > { %v897_v1 = vpop.eup %896 }
  0xcf   : > { %597 = vmatpush.msrb.mxu2 %v895_v63  ;;  %617 = vmatpush.msrb.mxu3 %v897_v1 }
  0xd0   : > { %825 = vmatmul.msk.f32.vlgmr.msrb.gmra.mxu2 %vm578_vm2, %v571_v0  ;;  %827 = vmatmul.msk.f32.vlgmr.msrb.gmra.mxu3 %vm578_vm2, %v571_v0 }
 0x153   : > { %v599_v7 = vpop.f32.mrf.mxu2  ;;  %v619_v8 = vpop.f32.mrf.mxu3 }
 0x154   : > { %v600_v9 = vadd.f32 %v599_v7, %v576_v6  ;;  %v620_v10 = vadd.f32 %v619_v8, %v576_v6 }
 0x156   : > { %v630_v11 = vsel %vm628_vm6, -inf, %v600_v9  ;;  %v631_v12 = vsel %vm629_vm7, -inf, %v620_v10 }
 0x157   : > { %632 = vst [vmem:[%s352_s30] sm:$0xff] %v630_v11 }
 0x158   : > { %633 = vst [vmem:[%s352_s30 + $0x8] sm:$0xff] %v631_v12 }
 0x159 PF: > { %s16_s23 = sadd.s32 1, %s920_s23   ;;  %s1197_s21 = smov %s916_s22 }
 0x15a   : > { %p13_p5 = scmp.ge.s32.totalorder %s16_s23, 4   ;;  %s1198_s22 = smov %s1200_s24 }
 0x15c   :  { %15 = sbr.rel (!%p13_p5) target bundleno = 2 (0x2), region = 80 }

</bundles_post_ra>
